<compile_context>
chip_gen: v5e
topology: v5e:2x2
jax: 0.10.0
libtpu: 0.0.40
codegen_flags: <defaults>
</compile_context>

<pallas_src>
import functools
import math

import jax
import jax.numpy as jnp
import numpy as np
from jax.experimental import pallas as pl
from jax.experimental.pallas import tpu as pltpu


def _round_up(a: int, b: int) -> int:
    return ((a + b - 1) // b) * b


def _poly_kernel(xt_ref, o_ref, acc_ref, *, degree: int, d: int, d_out: int):
    """One grid step over TL rows.

    xt_ref : (d, TL)      input tile  — features on sublanes, rows on lanes.
    o_ref  : (TL, d_out)  output tile — natural (M, d_out) layout.
    acc_ref: (d_scr, TL)  f32 scratch — transposed result tile (d_scr >= d_out).
    """
    tl = xt_ref.shape[1]
    x = xt_ref[...].astype(jnp.float32)                    # (d, TL), lane-dense

    # Degree-0 block: x itself.
    acc_ref[0:d, :] = x

    # Degree-k blocks: row (base + i*d + j) = p[i] * x[j]  (j fastest).
    # Each i produces one full-lane-width (d, TL) slab -> one store.
    prev_base, prev_dim = 0, d
    for _ in range(degree):
        base = prev_base + prev_dim
        for i in range(prev_dim):
            # Previous-degree row, broadcast over the d sublanes of x
            # (sublane broadcast; no lane slicing, no concatenates).
            p_i = acc_ref[prev_base + i:prev_base + i + 1, :]        # (1, TL) f32
            acc_ref[base + i * d:base + (i + 1) * d, :] = p_i * x    # (d, TL)
        prev_base, prev_dim = base, prev_dim * d

    # Transpose the assembled tile back to row-major in (d_scr, 128) chunks
    # (friendly XLU shape, bounded live values) and store lane-dense.
    for c in range(tl // 128):
        c0 = c * 128
        chunk = acc_ref[:, c0:c0 + 128]                    # (d_scr, 128) f32
        o_ref[c0:c0 + 128, :] = chunk.T[:, :d_out].astype(o_ref.dtype)


def _choose_row_tile(d: int, d_out: int, d_scr: int, itemsize: int):
    """Largest 128-multiple row tile fitting a generation-aware VMEM budget."""
    try:
        vmem_cap = pltpu.get_tpu_info().vmem_capacity_bytes
    except Exception:
        vmem_cap = 64 * 1024 * 1024           # v7x per-core VMEM (smallest in the fleet)
    budget = int(vmem_cap * 0.4)

    # Per-row-of-TL VMEM bytes, counting (8,128) tile padding of every block.
    per_tl = (2 * _round_up(d, 8) * itemsize            # double-buffered input block
              + 2 * _round_up(d_out, 128) * itemsize    # double-buffered output block
              + d_scr * 4                               # f32 transposed scratch
              + _round_up(d, 8) * 4)                    # in-kernel f32 copy of x
    const = 4 * 128 * d_scr * 4 + (2 << 20)             # transpose chunks + slack
    tl = (max(budget - const, 0) // max(per_tl, 1)) // 128 * 128
    tl = max(128, min(tl, 8192))                         # cap: amortizes ~0.35us/step
    vmem_limit = int(vmem_cap * 0.75)                    # ~48 MiB v7x, ~96 MiB v5e/v6e
    return tl, vmem_limit


def polynomial_features(x: jax.Array, degree: int, *, row_tile: int | None = None) -> jax.Array:
    """Pallas implementation of PolynomialFeatures(degree).forward(x)."""
    orig_shape = x.shape
    d = orig_shape[-1]
    d_out = sum(d ** k for k in range(1, degree + 2))
    lead = orig_shape[:-1]
    m = math.prod(lead) if lead else 1

    if degree == 0:
        return x
    if m == 0:
        return jnp.zeros((*lead, d_out), x.dtype)

    itemsize = jnp.dtype(x.dtype).itemsize
    d_scr = _round_up(d_out, 128)        # 128-aligned scratch rows -> clean (d_scr,128) transposes

    tl, vmem_limit = _choose_row_tile(d, d_out, d_scr, itemsize)
    if row_tile is not None:
        tl = _round_up(max(row_tile, 128), 128)

    if m < 128:
        # Tiny problem: one 128-row block; wrapper slices off the <128 pad rows.
        m_out, tl = 128, 128
    else:
        m_out = m                                   # output stays exactly (m, d_out): no slice-copy
        tl = min(tl, (m // 128) * 128)              # keep block <= output array
        if tl >= m and m >= 4096:                   # whole problem in one step:
            tl = min(_round_up(-(-m // 2), 128),    # split so v7x's 2 TensorCores both get work
                     (m // 128) * 128)
    grid_n = -(-m_out // tl)
    m_in = grid_n * tl                              # pad only the (tiny) input; never ragged reads

    x2 = x.reshape(m, d)
    if m_in != m:
        x2 = jnp.pad(x2, ((0, m_in - m), (0, 0)))
    xt = x2.T                                       # (d, m_in): cheap wrapper transpose of input

    kernel = functools.partial(_poly_kernel, degree=degree, d=d, d_out=d_out)

    out = pl.pallas_call(
        kernel,
        out_shape=jax.ShapeDtypeStruct((m_out, d_out), x.dtype),
        grid_spec=pltpu.PrefetchScalarGridSpec(
            num_scalar_prefetch=0,
            grid=(grid_n,),
            in_specs=[pl.BlockSpec((d, tl), lambda i: (0, i))],
            out_specs=pl.BlockSpec((tl, d_out), lambda i: (i, 0)),
            scratch_shapes=[pltpu.VMEM((d_scr, tl), jnp.float32)],
        ),
        compiler_params=pltpu.CompilerParams(
            dimension_semantics=("parallel",),
            vmem_limit_bytes=vmem_limit,
        ),
        # Elementwise products only; this is an HBM-write-bound kernel (no MXU).
        cost_estimate=pl.CostEstimate(
            flops=m * max(d_out - d, 0),
            transcendentals=0,
            bytes_accessed=m * (d + d_out) * itemsize,
        ),
    )(xt)

    if m_out != m:
        out = out[:m]
    return out.reshape(*lead, d_out)


def polynomial_features_ref(x: jax.Array, degree: int) -> jax.Array:
    """Pure-JAX reference mirroring the PyTorch module."""
    polys = [x]
    for _ in range(degree):
        outer = jnp.einsum('...i,...j->...ij', polys[-1], x)
        polys.append(outer.reshape(*outer.shape[:-2], -1))
    return jnp.concatenate(polys, axis=-1)


if __name__ == "__main__":
    key = jax.random.PRNGKey(0)

    # Typical PFC usage: point clouds with d=3 coordinates.
    B, N, d = 2, 8, 3
    degree = 2
    x = jax.random.normal(key, (B, N, d), dtype=jnp.float32)

    out = polynomial_features(x, degree)
    out = jax.block_until_ready(out)

    ref = polynomial_features_ref(x, degree)
    assert out.shape == (B, N, d + d ** 2 + d ** 3), out.shape
    np.testing.assert_allclose(np.asarray(out), np.asarray(ref), rtol=1e-6, atol=1e-6)

    # Ragged M (not a multiple of the tile), degree 3: exercises the clipped
    # writeback of the last output block and the multi-chunk transpose.
    x2 = jax.random.normal(jax.random.PRNGKey(0), (4, 125, 3), dtype=jnp.float32)
    out2 = jax.block_until_ready(polynomial_features(x2, 3))
    ref2 = polynomial_features_ref(x2, 3)
    assert out2.shape == ref2.shape, (out2.shape, ref2.shape)
    np.testing.assert_allclose(np.asarray(out2), np.asarray(ref2), rtol=1e-6, atol=1e-6)

    # Forced small row tile: exercises a multi-step grid with a ragged tail.
    out3 = jax.block_until_ready(polynomial_features(x2, 3, row_tile=256))
    np.testing.assert_allclose(np.asarray(out3), np.asarray(ref2), rtol=1e-6, atol=1e-6)

    print("KERNEL_OK")
</pallas_src>

<mosaic_0001>
module attributes {stable_mosaic.version = 11 : i64} {
  func.func @_poly_kernel(%arg0: i32, %arg1: memref<3x128xf32, #tpu.memory_space<vmem>>, %arg2: memref<128x39xf32, #tpu.memory_space<vmem>>, %arg3: memref<128x128xf32, #tpu.memory_space<vmem>>) attributes {dimension_semantics = [#tpu.dimension_semantics<parallel>], iteration_bounds = array<i64: 1>, scalar_prefetch = 0 : i64, scratch_operands = 1 : i64, tpu.core_type = #tpu.core_type<tc>, window_params = [{transform_indices = @transform_0, window_bounds = array<i64: 3, 128>}, {transform_indices = @transform_1, window_bounds = array<i64: 128, 39>}]} {
    %c0 = arith.constant 0 : index
    %c0_0 = arith.constant 0 : index
    %0 = vector.load %arg1[%c0, %c0_0] : memref<3x128xf32, #tpu.memory_space<vmem>>, vector<3x128xf32>
    %c0_1 = arith.constant 0 : index
    %c0_2 = arith.constant 0 : index
    %1 = vector.load %arg3[%c0_1, %c0_2] : memref<128x128xf32, #tpu.memory_space<vmem>>, vector<3x128xf32>
    tpu.vector_store %arg3[%c0_1, %c0_2], %0 {strides = array<i32>} : memref<128x128xf32, #tpu.memory_space<vmem>>, vector<3x128xf32>,
    %c0_3 = arith.constant 0 : index
    %c0_4 = arith.constant 0 : index
    %2 = vector.load %arg3[%c0_3, %c0_4] : memref<128x128xf32, #tpu.memory_space<vmem>>, vector<1x128xf32>
    %3 = vector.broadcast %2 : vector<1x128xf32> to vector<3x128xf32>
    %4 = arith.mulf %3, %0 : vector<3x128xf32>
    %c3 = arith.constant 3 : index
    %c0_5 = arith.constant 0 : index
    %5 = vector.load %arg3[%c3, %c0_5] : memref<128x128xf32, #tpu.memory_space<vmem>>, vector<3x128xf32>
    tpu.vector_store %arg3[%c3, %c0_5], %4 {strides = array<i32>} : memref<128x128xf32, #tpu.memory_space<vmem>>, vector<3x128xf32>,
    %c1 = arith.constant 1 : index
    %c0_6 = arith.constant 0 : index
    %6 = vector.load %arg3[%c1, %c0_6] : memref<128x128xf32, #tpu.memory_space<vmem>>, vector<1x128xf32>
    %7 = vector.broadcast %6 : vector<1x128xf32> to vector<3x128xf32>
    %8 = arith.mulf %7, %0 : vector<3x128xf32>
    %c6 = arith.constant 6 : index
    %c0_7 = arith.constant 0 : index
    %9 = vector.load %arg3[%c6, %c0_7] : memref<128x128xf32, #tpu.memory_space<vmem>>, vector<3x128xf32>
    tpu.vector_store %arg3[%c6, %c0_7], %8 {strides = array<i32>} : memref<128x128xf32, #tpu.memory_space<vmem>>, vector<3x128xf32>,
    %c2 = arith.constant 2 : index
    %c0_8 = arith.constant 0 : index
    %10 = vector.load %arg3[%c2, %c0_8] : memref<128x128xf32, #tpu.memory_space<vmem>>, vector<1x128xf32>
    %11 = vector.broadcast %10 : vector<1x128xf32> to vector<3x128xf32>
    %12 = arith.mulf %11, %0 : vector<3x128xf32>
    %c9 = arith.constant 9 : index
    %c0_9 = arith.constant 0 : index
    %13 = vector.load %arg3[%c9, %c0_9] : memref<128x128xf32, #tpu.memory_space<vmem>>, vector<3x128xf32>
    tpu.vector_store %arg3[%c9, %c0_9], %12 {strides = array<i32>} : memref<128x128xf32, #tpu.memory_space<vmem>>, vector<3x128xf32>,
    %c3_10 = arith.constant 3 : index
    %c0_11 = arith.constant 0 : index
    %14 = vector.load %arg3[%c3_10, %c0_11] : memref<128x128xf32, #tpu.memory_space<vmem>>, vector<1x128xf32>
    %15 = vector.broadcast %14 : vector<1x128xf32> to vector<3x128xf32>
    %16 = arith.mulf %15, %0 : vector<3x128xf32>
    %c12 = arith.constant 12 : index
    %c0_12 = arith.constant 0 : index
    %17 = vector.load %arg3[%c12, %c0_12] : memref<128x128xf32, #tpu.memory_space<vmem>>, vector<3x128xf32>
    tpu.vector_store %arg3[%c12, %c0_12], %16 {strides = array<i32>} : memref<128x128xf32, #tpu.memory_space<vmem>>, vector<3x128xf32>,
    %c4 = arith.constant 4 : index
    %c0_13 = arith.constant 0 : index
    %18 = vector.load %arg3[%c4, %c0_13] : memref<128x128xf32, #tpu.memory_space<vmem>>, vector<1x128xf32>
    %19 = vector.broadcast %18 : vector<1x128xf32> to vector<3x128xf32>
    %20 = arith.mulf %19, %0 : vector<3x128xf32>
    %c15 = arith.constant 15 : index
    %c0_14 = arith.constant 0 : index
    %21 = vector.load %arg3[%c15, %c0_14] : memref<128x128xf32, #tpu.memory_space<vmem>>, vector<3x128xf32>
    tpu.vector_store %arg3[%c15, %c0_14], %20 {strides = array<i32>} : memref<128x128xf32, #tpu.memory_space<vmem>>, vector<3x128xf32>,
    %c5 = arith.constant 5 : index
    %c0_15 = arith.constant 0 : index
    %22 = vector.load %arg3[%c5, %c0_15] : memref<128x128xf32, #tpu.memory_space<vmem>>, vector<1x128xf32>
    %23 = vector.broadcast %22 : vector<1x128xf32> to vector<3x128xf32>
    %24 = arith.mulf %23, %0 : vector<3x128xf32>
    %c18 = arith.constant 18 : index
    %c0_16 = arith.constant 0 : index
    %25 = vector.load %arg3[%c18, %c0_16] : memref<128x128xf32, #tpu.memory_space<vmem>>, vector<3x128xf32>
    tpu.vector_store %arg3[%c18, %c0_16], %24 {strides = array<i32>} : memref<128x128xf32, #tpu.memory_space<vmem>>, vector<3x128xf32>,
    %c6_17 = arith.constant 6 : index
    %c0_18 = arith.constant 0 : index
    %26 = vector.load %arg3[%c6_17, %c0_18] : memref<128x128xf32, #tpu.memory_space<vmem>>, vector<1x128xf32>
    %27 = vector.broadcast %26 : vector<1x128xf32> to vector<3x128xf32>
    %28 = arith.mulf %27, %0 : vector<3x128xf32>
    %c21 = arith.constant 21 : index
    %c0_19 = arith.constant 0 : index
    %29 = vector.load %arg3[%c21, %c0_19] : memref<128x128xf32, #tpu.memory_space<vmem>>, vector<3x128xf32>
    tpu.vector_store %arg3[%c21, %c0_19], %28 {strides = array<i32>} : memref<128x128xf32, #tpu.memory_space<vmem>>, vector<3x128xf32>,
    %c7 = arith.constant 7 : index
    %c0_20 = arith.constant 0 : index
    %30 = vector.load %arg3[%c7, %c0_20] : memref<128x128xf32, #tpu.memory_space<vmem>>, vector<1x128xf32>
    %31 = vector.broadcast %30 : vector<1x128xf32> to vector<3x128xf32>
    %32 = arith.mulf %31, %0 : vector<3x128xf32>
    %c24 = arith.constant 24 : index
    %c0_21 = arith.constant 0 : index
    %33 = vector.load %arg3[%c24, %c0_21] : memref<128x128xf32, #tpu.memory_space<vmem>>, vector<3x128xf32>
    tpu.vector_store %arg3[%c24, %c0_21], %32 {strides = array<i32>} : memref<128x128xf32, #tpu.memory_space<vmem>>, vector<3x128xf32>,
    %c8 = arith.constant 8 : index
    %c0_22 = arith.constant 0 : index
    %34 = vector.load %arg3[%c8, %c0_22] : memref<128x128xf32, #tpu.memory_space<vmem>>, vector<1x128xf32>
    %35 = vector.broadcast %34 : vector<1x128xf32> to vector<3x128xf32>
    %36 = arith.mulf %35, %0 : vector<3x128xf32>
    %c27 = arith.constant 27 : index
    %c0_23 = arith.constant 0 : index
    %37 = vector.load %arg3[%c27, %c0_23] : memref<128x128xf32, #tpu.memory_space<vmem>>, vector<3x128xf32>
    tpu.vector_store %arg3[%c27, %c0_23], %36 {strides = array<i32>} : memref<128x128xf32, #tpu.memory_space<vmem>>, vector<3x128xf32>,
    %c9_24 = arith.constant 9 : index
    %c0_25 = arith.constant 0 : index
    %38 = vector.load %arg3[%c9_24, %c0_25] : memref<128x128xf32, #tpu.memory_space<vmem>>, vector<1x128xf32>
    %39 = vector.broadcast %38 : vector<1x128xf32> to vector<3x128xf32>
    %40 = arith.mulf %39, %0 : vector<3x128xf32>
    %c30 = arith.constant 30 : index
    %c0_26 = arith.constant 0 : index
    %41 = vector.load %arg3[%c30, %c0_26] : memref<128x128xf32, #tpu.memory_space<vmem>>, vector<3x128xf32>
    tpu.vector_store %arg3[%c30, %c0_26], %40 {strides = array<i32>} : memref<128x128xf32, #tpu.memory_space<vmem>>, vector<3x128xf32>,
    %c10 = arith.constant 10 : index
    %c0_27 = arith.constant 0 : index
    %42 = vector.load %arg3[%c10, %c0_27] : memref<128x128xf32, #tpu.memory_space<vmem>>, vector<1x128xf32>
    %43 = vector.broadcast %42 : vector<1x128xf32> to vector<3x128xf32>
    %44 = arith.mulf %43, %0 : vector<3x128xf32>
    %c33 = arith.constant 33 : index
    %c0_28 = arith.constant 0 : index
    %45 = vector.load %arg3[%c33, %c0_28] : memref<128x128xf32, #tpu.memory_space<vmem>>, vector<3x128xf32>
    tpu.vector_store %arg3[%c33, %c0_28], %44 {strides = array<i32>} : memref<128x128xf32, #tpu.memory_space<vmem>>, vector<3x128xf32>,
    %c11 = arith.constant 11 : index
    %c0_29 = arith.constant 0 : index
    %46 = vector.load %arg3[%c11, %c0_29] : memref<128x128xf32, #tpu.memory_space<vmem>>, vector<1x128xf32>
    %47 = vector.broadcast %46 : vector<1x128xf32> to vector<3x128xf32>
    %48 = arith.mulf %47, %0 : vector<3x128xf32>
    %c36 = arith.constant 36 : index
    %c0_30 = arith.constant 0 : index
    %49 = vector.load %arg3[%c36, %c0_30] : memref<128x128xf32, #tpu.memory_space<vmem>>, vector<3x128xf32>
    tpu.vector_store %arg3[%c36, %c0_30], %48 {strides = array<i32>} : memref<128x128xf32, #tpu.memory_space<vmem>>, vector<3x128xf32>,
    %c0_31 = arith.constant 0 : index
    %c0_32 = arith.constant 0 : index
    %50 = vector.load %arg3[%c0_31, %c0_32] : memref<128x128xf32, #tpu.memory_space<vmem>>, vector<128x128xf32>
    %51 = tpu.transpose %50, [1, 0] : vector<128x128xf32> -> vector<128x128xf32>
    %52 = vector.extract_strided_slice %51 {offsets = [0, 0], sizes = [128, 39], strides = [1, 1]} : vector<128x128xf32> to vector<128x39xf32>
    %c0_33 = arith.constant 0 : index
    %c0_34 = arith.constant 0 : index
    %53 = vector.load %arg2[%c0_33, %c0_34] : memref<128x39xf32, #tpu.memory_space<vmem>>, vector<128x39xf32>
    tpu.vector_store %arg2[%c0_33, %c0_34], %52 {strides = array<i32>} : memref<128x39xf32, #tpu.memory_space<vmem>>, vector<128x39xf32>,
    return
  }
  func.func @transform_0(%arg0: i32) -> (i32, i32) {
    %c0_i32 = arith.constant 0 : i32
    %c0_i32_0 = arith.constant 0 : i32
    return %c0_i32, %arg0 : i32, i32
  }
  func.func @transform_1(%arg0: i32) -> (i32, i32) {
    %c0_i32 = arith.constant 0 : i32
    %c0_i32_0 = arith.constant 0 : i32
    return %arg0, %c0_i32 : i32, i32
  }
}

</mosaic_0001>

<bundles_post_ra>
// kernel: tpu_custom_call.1
= control target key start
LH: loop header
LB: loop body
LE: loop exit
PB: predicated region body
PF: predicated region fallthrough
CT: control target
= control target key end

     0   :  { %6 = vsyncpa [#allocation4], 0  ;;  %s181_s9 = smov [#allocation3]   ;;  %s259_s0 = inlined_call_operand.hbm [shape: f32[3,128], index: 0, kind: input, shape index: {}]   ;;  %s260_s1 = inlined_call_operand.vmem [shape: f32[128,39], index: 1, kind: output, shape index: {}]  }
   0x1   :  { %s12_s8 = sshll.u32 %s259_s0, 4  ;;  %s14_s10 = sshll.u32 %s181_s9, 4  ;;  %s13_s8 = int_to_ptr.hbm [resolvable:$true] %s12_s8  ;;  %s15_s10 = int_to_ptr.vmem [resolvable:$true] %s14_s10 }
   0x2   :  { %17 = dma.hbm_to_vmem [thread:$0]  %s13_s8, 64, %s15_s10, [#allocation4]  }
   0x3   :  { %179 = dma.done.wait [#allocation4], 64  }
   0x4   :  { %180 = vsyncadd [#allocation4], 4294967232  ;;  %v22_v0 = vld [vmem:[#allocation3] sm:$0x7]  ;;  %v77_v30 = vld [vmem:[#allocation2 + $0x28] sm:$0xff]  ;;  %vm120_vm0 = vcmask 318464  }
   0x5   :  { %23 = vst [vmem:[#allocation2] sm:$0x7] %v22_v0  ;;  %v78_v31 = vld [vmem:[#allocation2 + $0x30] sm:$0xff]  ;;  %v79_v32 = vld [vmem:[#allocation2 + $0x38] sm:$0xff]  ;;  %v80_v33 = vld [vmem:[#allocation2 + $0x40] sm:$0xff] }
   0x6   :  { %v81_v34 = vld [vmem:[#allocation2 + $0x48] sm:$0xff]  ;;  %v82_v35 = vld [vmem:[#allocation2 + $0x50] sm:$0xff]  ;;  %v83_v36 = vld [vmem:[#allocation2 + $0x58] sm:$0xff] }
   0x7   :  { %v84_v37 = vld [vmem:[#allocation2 + $0x60] sm:$0xff]  ;;  %v85_v38 = vld [vmem:[#allocation2 + $0x68] sm:$0xff]  ;;  %v86_v39 = vld [vmem:[#allocation2 + $0x70] sm:$0xff] }
   0x8   :  { %v87_v40 = vld [vmem:[#allocation2 + $0x78] sm:$0xff] }
   0xc   :  { %v143_v1 = vld [vmem:[#allocation2] ss:$0 sm:$0xff]  ;;  %v144_v2 = vld [vmem:[#allocation2 + $0x1] ss:$0 sm:$0xff]  ;;  %v145_v3 = vld [vmem:[#allocation2 + $0x2] ss:$0 sm:$0xff] }
   0xd   :  { %v26_v4 = vmul.f32 %v143_v1, %v22_v0  ;;  %v30_v5 = vmul.f32 %v144_v2, %v22_v0  ;;  %v34_v6 = vmul.f32 %v145_v3, %v22_v0 }
   0xf   :  { %27 = vst [vmem:[#allocation2 + $0x3] sm:$0x7] %v26_v4 }
  0x10   :  { %31 = vst [vmem:[#allocation2 + $0x6] sm:$0x7] %v30_v5 }
  0x11   :  { %35 = vst [vmem:[#allocation2 + $0x9] sm:$0x7] %v34_v6 }
  0x16   :  { %v146_v7 = vld [vmem:[#allocation2 + $0x3] ss:$0 sm:$0xff]  ;;  %v147_v9 = vld [vmem:[#allocation2 + $0x4] ss:$0 sm:$0xff]  ;;  %v148_v11 = vld [vmem:[#allocation2 + $0x5] ss:$0 sm:$0xff] }
  0x17   :  { %v72_v8 = vld [vmem:[#allocation2] sm:$0xff]  ;;  %v38_v10 = vmul.f32 %v146_v7, %v22_v0  ;;  %v42_v13 = vmul.f32 %v147_v9, %v22_v0  ;;  %v46_v15 = vmul.f32 %v148_v11, %v22_v0  ;;  %v151_v17 = vld [vmem:[#allocation2 + $0x8] ss:$0 sm:$0xff] }
  0x18   :  { %88 = vxpose.xlu0.b32.start [1/16] %v72_v8, 128  ;;  %v149_v12 = vld [vmem:[#allocation2 + $0x6] ss:$0 sm:$0xff]  ;;  %v150_v14 = vld [vmem:[#allocation2 + $0x7] ss:$0 sm:$0xff]  ;;  %v152_v19 = vld [vmem:[#allocation2 + $0x9] ss:$0 sm:$0xff]  ;;  %v58_v20 = vmul.f32 %v151_v17, %v22_v0 }
  0x19   :  { %39 = vst [vmem:[#allocation2 + $0xc] sm:$0x7] %v38_v10  ;;  %v50_v16 = vmul.f32 %v149_v12, %v22_v0  ;;  %v54_v18 = vmul.f32 %v150_v14, %v22_v0  ;;  %v153_v21 = vld [vmem:[#allocation2 + $0xa] ss:$0 sm:$0xff]  ;;  %v62_v22 = vmul.f32 %v152_v19, %v22_v0  ;;  %v154_v23 = vld [vmem:[#allocation2 + $0xb] ss:$0 sm:$0xff] }
  0x1a   :  { %43 = vst [vmem:[#allocation2 + $0xf] sm:$0x7] %v42_v13  ;;  %v66_v24 = vmul.f32 %v153_v21, %v22_v0  ;;  %v70_v25 = vmul.f32 %v154_v23, %v22_v0 }
  0x1b   :  { %47 = vst [vmem:[#allocation2 + $0x12] sm:$0x7] %v46_v15 }
  0x1c   :  { %51 = vst [vmem:[#allocation2 + $0x15] sm:$0x7] %v50_v16 }
  0x1d   :  { %55 = vst [vmem:[#allocation2 + $0x18] sm:$0x7] %v54_v18 }
  0x1e   :  { %59 = vst [vmem:[#allocation2 + $0x1b] sm:$0x7] %v58_v20 }
  0x1f   :  { %63 = vst [vmem:[#allocation2 + $0x1e] sm:$0x7] %v62_v22 }
  0x20   :  { %67 = vst [vmem:[#allocation2 + $0x21] sm:$0x7] %v66_v24 }
  0x21   :  { %v73_v26 = vld [vmem:[#allocation2 + $0x8] sm:$0xff]  ;;  %71 = vst [vmem:[#allocation2 + $0x24] sm:$0x7] %v70_v25 }
  0x22   :  { %89 = vxpose.xlu0.b32.cont [2/16] %v73_v26, 128 }
  0x23   :  { %v74_v27 = vld [vmem:[#allocation2 + $0x10] sm:$0xff] }
  0x26   :  { %v75_v28 = vld [vmem:[#allocation2 + $0x18] sm:$0xff] }
  0x28   :  { %v76_v29 = vld [vmem:[#allocation2 + $0x20] sm:$0xff] }
  0x2a   :  { %90 = vxpose.xlu0.b32.cont [3/16] %v74_v27, 128 }
  0x32   :  { %91 = vxpose.xlu0.b32.cont [4/16] %v75_v28, 128 }
  0x3a   :  { %92 = vxpose.xlu0.b32.cont [5/16] %v76_v29, 128 }
  0x42   :  { %93 = vxpose.xlu0.b32.cont [6/16] %v77_v30, 128 }
  0x4a   :  { %94 = vxpose.xlu0.b32.cont [7/16] %v78_v31, 128 }
  0x52   :  { %95 = vxpose.xlu0.b32.cont [8/16] %v79_v32, 128 }
  0x5a   :  { %96 = vxpose.xlu0.b32.cont [9/16] %v80_v33, 128 }
  0x62   :  { %97 = vxpose.xlu0.b32.cont [10/16] %v81_v34, 128 }
  0x6a   :  { %98 = vxpose.xlu0.b32.cont [11/16] %v82_v35, 128 }
  0x72   :  { %99 = vxpose.xlu0.b32.cont [12/16] %v83_v36, 128 }
  0x7a   :  { %100 = vxpose.xlu0.b32.cont [13/16] %v84_v37, 128 }
  0x82   :  { %101 = vxpose.xlu0.b32.cont [14/16] %v85_v38, 128 }
  0x8a   :  { %102 = vxpose.xlu0.b32.cont [15/16] %v86_v39, 128 }
  0x92   :  { %103 = vxpose.xlu0.b32.end [16/16] %v87_v40, 128 }
  0xbe   :  { %v104_v41 = vpop.trf.xlu0 }
  0xbf   :  { %121 = vst.msk [vmem:[%s260_s1] sm:$0xff] %vm120_vm0, %v104_v41 }
  0xc6   :  { %v105_v42 = vpop.trf.xlu0 }
  0xc7   :  { %122 = vst.msk [vmem:[%s260_s1 + $0x8] sm:$0xff] %vm120_vm0, %v105_v42 }
  0xce   :  { %v106_v43 = vpop.trf.xlu0 }
  0xcf   :  { %123 = vst.msk [vmem:[%s260_s1 + $0x10] sm:$0xff] %vm120_vm0, %v106_v43 }
  0xd6   :  { %v107_v44 = vpop.trf.xlu0 }
  0xd7   :  { %124 = vst.msk [vmem:[%s260_s1 + $0x18] sm:$0xff] %vm120_vm0, %v107_v44 }
  0xde   :  { %v108_v45 = vpop.trf.xlu0 }
  0xdf   :  { %125 = vst.msk [vmem:[%s260_s1 + $0x20] sm:$0xff] %vm120_vm0, %v108_v45 }
  0xe6   :  { %v109_v46 = vpop.trf.xlu0 }
  0xe7   :  { %126 = vst.msk [vmem:[%s260_s1 + $0x28] sm:$0xff] %vm120_vm0, %v109_v46 }
  0xee   :  { %v110_v47 = vpop.trf.xlu0 }
  0xef   :  { %127 = vst.msk [vmem:[%s260_s1 + $0x30] sm:$0xff] %vm120_vm0, %v110_v47 }
  0xf6   :  { %v111_v48 = vpop.trf.xlu0 }
  0xf7   :  { %128 = vst.msk [vmem:[%s260_s1 + $0x38] sm:$0xff] %vm120_vm0, %v111_v48 }
  0xfe   :  { %v112_v49 = vpop.trf.xlu0 }
  0xff   :  { %129 = vst.msk [vmem:[%s260_s1 + $0x40] sm:$0xff] %vm120_vm0, %v112_v49 }
 0x106   :  { %v113_v50 = vpop.trf.xlu0 }
 0x107   :  { %130 = vst.msk [vmem:[%s260_s1 + $0x48] sm:$0xff] %vm120_vm0, %v113_v50 }
 0x10e   :  { %v114_v51 = vpop.trf.xlu0 }
 0x10f   :  { %131 = vst.msk [vmem:[%s260_s1 + $0x50] sm:$0xff] %vm120_vm0, %v114_v51 }
 0x116   :  { %v115_v52 = vpop.trf.xlu0 }
 0x117   :  { %132 = vst.msk [vmem:[%s260_s1 + $0x58] sm:$0xff] %vm120_vm0, %v115_v52 }
 0x11e   :  { %v116_v53 = vpop.trf.xlu0 }
 0x11f   :  { %133 = vst.msk [vmem:[%s260_s1 + $0x60] sm:$0xff] %vm120_vm0, %v116_v53 }
 0x126   :  { %v117_v54 = vpop.trf.xlu0 }
 0x127   :  { %134 = vst.msk [vmem:[%s260_s1 + $0x68] sm:$0xff] %vm120_vm0, %v117_v54 }
 0x12e   :  { %v118_v55 = vpop.trf.xlu0 }
 0x12f   :  { %135 = vst.msk [vmem:[%s260_s1 + $0x70] sm:$0xff] %vm120_vm0, %v118_v55 }
 0x136   :  { %v119_v56 = vpop.trf.xlu0 }
 0x137   :  { %136 = vst.msk [vmem:[%s260_s1 + $0x78] sm:$0xff] %vm120_vm0, %v119_v56 }
 0x138   :  { %141 = vsyncpa [#allocation4], 1 }

</bundles_post_ra>
